<compile_context>
chip_gen: v5e
topology: v5e:2x2
jax: 0.10.0
libtpu: 0.0.40
codegen_flags: <defaults>
</compile_context>

<pallas_src>
import functools

import jax
import jax.numpy as jnp
from jax.experimental import pallas as pl
from jax.experimental.pallas import tpu as pltpu

LANES = 128
SUBLANES = 8
CHUNK = SUBLANES * LANES          # 1024 elements = one (8,128) f32 vreg
EPS = 1e-07

# ~8 MiB per input tile (16 MiB double-buffered).
TARGET_TILE_BYTES = 8 * 1024 * 1024
# Independent accumulator chains to break the serial VPU add dependency.
MAX_ACC_K = 8
VMEM_LIMIT_BYTES = 32 * 1024 * 1024


def _num_tensorcores():
    """Best-effort TensorCores-per-device (megacore parts -> 2, else 1)."""
    try:
        kind = jax.devices()[0].device_kind.lower()
    except Exception:
        return 1
    if any(tag in kind for tag in ("v7", "7x", "v4", "v5p")):
        return 2
    return 1


def _make_kernel(tiles_per_shard, tile_rows, tiles_total, valid_rows, acc_k,
                 needs_mask):
    """Reduction kernel with static tiling parameters baked in."""
    groups = tile_rows // SUBLANES
    outer = groups // acc_k

    def _partial(contrib):
        # (tile_rows,128) -> (outer, acc_k, 8, 128) -> sum over `outer`.
        # acc_k independent chains keep the VALU slots busy instead of
        # serializing on a single accumulator vreg's add latency.
        return contrib.reshape(outer, acc_k, SUBLANES, LANES).sum(axis=0)

    def kernel(x_ref, out_ref):
        c = pl.program_id(0)          # core shard (parallel)
        i = pl.program_id(1)          # reduction step (arbitrary, innermost)

        @pl.when(i == 0)
        def _():
            out_ref[...] = jnp.zeros_like(out_ref)

        x = x_ref[...].astype(jnp.float32)
        contrib = -x * jnp.log(x + EPS)

        if not needs_mask:
            out_ref[0] += _partial(contrib)
        else:
            t = c * tiles_per_shard + i        # logical (UNclamped) tile index

            @pl.when(t < tiles_total - 1)
            def _():                            # interior tile: no mask work
                out_ref[0] += _partial(contrib)

            @pl.when(t >= tiles_total - 1)
            def _():                            # ragged tail / padded duplicate
                row0 = t * tile_rows
                local = jax.lax.broadcasted_iota(jnp.int32,
                                                 (tile_rows, LANES), 0)
                masked = jnp.where(row0 + local < valid_rows, contrib, 0.0)
                out_ref[0] += _partial(masked)

    return kernel


@functools.partial(jax.jit, static_argnames=("_force_tile_rows", "_force_shards"))
def sparse_loss(x, *, _force_tile_rows=None, _force_shards=None):
    """x: (N, C, H, W). Returns scalar f32 = sum(-x*log(x+1e-7)) / N / H / W."""
    N, C, H, W = x.shape
    total = N * C * H * W
    denom = float(N) * float(H) * float(W)

    flat = x.reshape(-1)
    # Largest 1024-aligned prefix -> (rows,128) slab with rows % 8 == 0, no pad copy.
    main = (total // CHUNK) * CHUNK

    if main < total:
        rem = flat[main:].astype(jnp.float32)          # < 1024 elements
        tail_sum = jnp.sum(-rem * jnp.log(rem + EPS))
    else:
        tail_sum = jnp.float32(0.0)

    if main == 0:
        return (tail_sum / denom).astype(jnp.float32)

    rows = main // LANES                               # multiple of 8
    slab = flat[:main].reshape(rows, LANES)            # zero-copy when aligned

    itemsize = jnp.dtype(x.dtype).itemsize
    max_tile_rows = max(
        SUBLANES,
        (TARGET_TILE_BYTES // (LANES * itemsize)) // SUBLANES * SUBLANES)
    tile_rows = min(max_tile_rows, rows)
    if _force_tile_rows is not None:
        tile_rows = min(int(_force_tile_rows), rows)
    # tile_rows is a multiple of 8 by construction.

    tiles_total = pl.cdiv(rows, tile_rows)
    n_shards = _num_tensorcores() if _force_shards is None else int(_force_shards)
    n_shards = max(1, min(n_shards, tiles_total))
    tiles_per_shard = pl.cdiv(tiles_total, n_shards)

    ragged = (rows % tile_rows) != 0
    shard_pad = (n_shards * tiles_per_shard) != tiles_total
    needs_mask = ragged or shard_pad

    groups = tile_rows // SUBLANES
    acc_k = 1
    for cand in (MAX_ACC_K, 4, 2):
        if groups % cand == 0:
            acc_k = cand
            break

    kernel = _make_kernel(tiles_per_shard, tile_rows, tiles_total, rows, acc_k,
                          needs_mask)

    if shard_pad:
        # Clamp so shard-padding steps re-read the last real tile (never a
        # fully out-of-bounds DMA); the in-kernel mask, based on the UNclamped
        # logical index, zeroes the duplicated contribution.
        def in_index(c, i):
            return (jnp.minimum(c * tiles_per_shard + i, tiles_total - 1), 0)
    else:
        def in_index(c, i):
            return (c * tiles_per_shard + i, 0)

    partials = pl.pallas_call(
        kernel,
        out_shape=jax.ShapeDtypeStruct((n_shards, acc_k, SUBLANES, LANES),
                                       jnp.float32),
        grid_spec=pltpu.PrefetchScalarGridSpec(
            num_scalar_prefetch=0,
            grid=(n_shards, tiles_per_shard),
            in_specs=[pl.BlockSpec((tile_rows, LANES), in_index)],
            out_specs=pl.BlockSpec((1, acc_k, SUBLANES, LANES),
                                   lambda c, i: (c, 0, 0, 0)),
        ),
        compiler_params=pltpu.CompilerParams(
            dimension_semantics=("parallel", "arbitrary"),
            vmem_limit_bytes=VMEM_LIMIT_BYTES,
        ),
    )(slab)

    # Tiny final reduce + normalization in plain JAX.
    return ((jnp.sum(partials) + tail_sum) / denom).astype(jnp.float32)


if __name__ == "__main__":
    # Primary test: nominal small shape, perfectly aligned (2048 elements).
    key = jax.random.PRNGKey(0)
    N, C, H, W = 2, 4, 16, 16
    x = jax.random.uniform(key, (N, C, H, W), dtype=jnp.float32,
                           minval=0.0, maxval=1.0)
    out = sparse_loss(x)
    jax.block_until_ready(out)
    ref = jnp.sum(-x * jnp.log(x + 1e-07)) / N / H / W
    assert jnp.allclose(out, ref, rtol=1e-5, atol=1e-5), (out, ref)

    # Ragged-path test: element count not a multiple of 1024 (JAX tail),
    # rows not a multiple of tile_rows (in-kernel ragged mask), and forced
    # 2-way sharding with shard padding (clamped index_map + duplicate-tile
    # mask).  Correct on any chip; 2 shards just run serially on 1-TC parts.
    key2 = jax.random.PRNGKey(0)
    N2, C2, H2, W2 = 2, 4, 27, 26          # 5616 elems -> 40 rows + 496 tail
    x2 = jax.random.uniform(key2, (N2, C2, H2, W2), dtype=jnp.float32,
                            minval=0.0, maxval=1.0)
    out2 = sparse_loss(x2, _force_tile_rows=16, _force_shards=2)
    jax.block_until_ready(out2)
    ref2 = jnp.sum(-x2 * jnp.log(x2 + 1e-07)) / N2 / H2 / W2
    assert jnp.allclose(out2, ref2, rtol=1e-5, atol=1e-5), (out2, ref2)

    print("KERNEL_OK")
</pallas_src>

<mosaic_0001>
module attributes {stable_mosaic.version = 11 : i64} {
  func.func @kernel(%arg0: i32, %arg1: i32, %arg2: memref<16x128xf32, #tpu.memory_space<vmem>>, %arg3: memref<1x2x8x128xf32, #tpu.memory_space<vmem>>) attributes {dimension_semantics = [#tpu.dimension_semantics<parallel>, #tpu.dimension_semantics<arbitrary>], iteration_bounds = array<i64: 1, 1>, scalar_prefetch = 0 : i64, scratch_operands = 0 : i64, tpu.core_type = #tpu.core_type<tc>, window_params = [{transform_indices = @transform_0, window_bounds = array<i64: 16, 128>}, {transform_indices = @transform_1, window_bounds = array<i64: 1, 2, 8, 128>}]} {
    %c0_i32 = arith.constant 0 : i32
    %0 = arith.cmpi eq, %arg1, %c0_i32 : i32
    %1 = arith.extui %0 : i1 to i32
    %c0_i32_0 = arith.constant 0 : i32
    %2 = arith.cmpi ne, %1, %c0_i32_0 : i32
    scf.if %2 {
      %cst_12 = arith.constant 0.000000e+00 : f32
      %18 = vector.broadcast %cst_12 : f32 to vector<1x2x8x128xf32>
      %c0_13 = arith.constant 0 : index
      %c0_14 = arith.constant 0 : index
      %c0_15 = arith.constant 0 : index
      %c0_16 = arith.constant 0 : index
      %19 = vector.load %arg3[%c0_13, %c0_14, %c0_15, %c0_16] : memref<1x2x8x128xf32, #tpu.memory_space<vmem>>, vector<1x2x8x128xf32>
      tpu.vector_store %arg3[%c0_13, %c0_14, %c0_15, %c0_16], %18 {strides = array<i32>} : memref<1x2x8x128xf32, #tpu.memory_space<vmem>>, vector<1x2x8x128xf32>,
    } else {
    }
    %c0 = arith.constant 0 : index
    %c0_1 = arith.constant 0 : index
    %3 = vector.load %arg2[%c0, %c0_1] : memref<16x128xf32, #tpu.memory_space<vmem>>, vector<16x128xf32>
    %cst = arith.constant 0.000000e+00 : f32
    %4 = vector.broadcast %cst : f32 to vector<16x128xf32>
    %5 = arith.subf %4, %3 : vector<16x128xf32>
    %cst_2 = arith.constant 1.000000e-07 : f32
    %6 = vector.broadcast %cst_2 : f32 to vector<16x128xf32>
    %7 = arith.addf %3, %6 : vector<16x128xf32>
    %8 = math.log %7 : vector<16x128xf32>
    %9 = arith.mulf %5, %8 : vector<16x128xf32>
    %c0_3 = arith.constant 0 : index
    %c0_4 = arith.constant 0 : index
    %c0_5 = arith.constant 0 : index
    %c0_6 = arith.constant 0 : index
    %10 = vector.load %arg3[%c0_3, %c0_4, %c0_5, %c0_6] : memref<1x2x8x128xf32, #tpu.memory_space<vmem>>, vector<1x2x8x128xf32>
    %11 = vector.shape_cast %10 : vector<1x2x8x128xf32> to vector<2x8x128xf32>
    %12 = vector.shape_cast %9 : vector<16x128xf32> to vector<1x2x8x128xf32>
    %cst_7 = arith.constant dense<0.000000e+00> : vector<2x8x128xf32>
    %13 = vector.multi_reduction <add>, %12, %cst_7 [0] : vector<1x2x8x128xf32> to vector<2x8x128xf32>
    %14 = arith.addf %11, %13 : vector<2x8x128xf32>
    %c0_8 = arith.constant 0 : index
    %c0_9 = arith.constant 0 : index
    %c0_10 = arith.constant 0 : index
    %c0_11 = arith.constant 0 : index
    %15 = vector.load %arg3[%c0_8, %c0_9, %c0_10, %c0_11] : memref<1x2x8x128xf32, #tpu.memory_space<vmem>>, vector<1x2x8x128xf32>
    %16 = vector.shape_cast %15 : vector<1x2x8x128xf32> to vector<2x8x128xf32>
    %17 = vector.shape_cast %14 : vector<2x8x128xf32> to vector<1x2x8x128xf32>
    tpu.vector_store %arg3[%c0_8, %c0_9, %c0_10, %c0_11], %17 {strides = array<i32>} : memref<1x2x8x128xf32, #tpu.memory_space<vmem>>, vector<1x2x8x128xf32>,
    return
  }
  func.func @transform_0(%arg0: i32, %arg1: i32) -> (i32, i32) {
    %c1_i32 = arith.constant 1 : i32
    %0 = arith.muli %arg0, %c1_i32 : i32
    %1 = arith.addi %0, %arg1 : i32
    %c0_i32 = arith.constant 0 : i32
    %c0_i32_0 = arith.constant 0 : i32
    return %1, %c0_i32 : i32, i32
  }
  func.func @transform_1(%arg0: i32, %arg1: i32) -> (i32, i32, i32, i32) {
    %c0_i32 = arith.constant 0 : i32
    %c0_i32_0 = arith.constant 0 : i32
    %c0_i32_1 = arith.constant 0 : i32
    %c0_i32_2 = arith.constant 0 : i32
    return %arg0, %c0_i32, %c0_i32_0, %c0_i32_1 : i32, i32, i32, i32
  }
}

</mosaic_0001>

<bundles_post_ra>
// kernel: sparse_loss.1
= control target key start
LH: loop header
LB: loop body
LE: loop exit
PB: predicated region body
PF: predicated region fallthrough
CT: control target
= control target key end

     0   :  { %s93_s0 = inlined_call_operand.vmem [shape: f32[16,128], index: 0, kind: input, shape index: {}]   ;;  %s94_s1 = inlined_call_operand.vmem [shape: f32[1,2,8,128], index: 1, kind: output, shape index: {}]  }
   0x1   :  { %v36_v0 = vld [vmem:[%s93_s0] sm:$0xff]  ;;  %v37_v1 = vld [vmem:[%s93_s0 + $0x8] sm:$0xff] }
   0x2   :  { %v40_v2 = vadd.f32 1e-07, %v36_v0  ;;  %v41_v3 = vadd.f32 1e-07, %v37_v1  ;;  %v38_v4 = vsub.f32 0.0, %v36_v0  ;;  %v39_v6 = vsub.f32 0.0, %v37_v1 }
   0x4   :  { %67 = vlog2.f32 %v40_v2 }
   0x5   :  { %69 = vlog2.f32 %v41_v3 }
   0xa   :  { %v68_v5 = vpop.eup %67 }
   0xb   :  { %v70_v7 = vpop.eup %69  ;;  %v43_v8 = vmul.f32 0.6931472, %v68_v5 }
   0xc   :  { %v45_v9 = vmul.f32 0.6931472, %v70_v7 }
   0xd   :  { %v46_v10 = vmul.f32 %v43_v8, %v38_v4 }
   0xe   :  { %v47_v11 = vmul.f32 %v45_v9, %v39_v6 }
   0xf   :  { %54 = vst [vmem:[%s94_s1] sm:$0xff] %v46_v10 }
  0x10   :  { %55 = vst [vmem:[%s94_s1 + $0x8] sm:$0xff] %v47_v11 }

</bundles_post_ra>
